<compile_context>
chip_gen: v7x
topology: tpu7x:2x2x1
jax: 0.10.0
libtpu: 0.0.40
codegen_flags: <defaults>
</compile_context>

<pallas_src>
import functools

import jax
import jax.numpy as jnp
from jax.experimental import pallas as pl
from jax.experimental.pallas import tpu as pltpu


def _asp_kernel(x_ref, wv_ref, bv_ref, o_ref, *, T, C):
    # x_ref: (Bt, T, C)   wv_ref: (1, C)   bv_ref: (1, 1)   o_ref: (Bt, 2*C)
    x = x_ref[...].astype(jnp.float32)                        # (Bt, T, C)
    wv = wv_ref[...].astype(jnp.float32)                      # (1, C)
    bv = bv_ref[...].astype(jnp.float32)                      # (1, 1)

    # Folded attention scores, lane-dense over time: (Bt, T).
    raw = jnp.sum(x * wv[None, :, :], axis=-1)                # (Bt, T)
    scores = jnp.tanh(raw + bv)                               # (Bt, T)

    # Numerically-stable softmax over time (lane axis), exact f32.
    m = jnp.max(scores, axis=-1, keepdims=True)               # (Bt, 1)
    e = jnp.exp(scores - m)                                   # (Bt, T)
    denom = jnp.sum(e, axis=-1, keepdims=True)                # (Bt, 1)
    attn = e / denom                                          # (Bt, T)

    # Weighted statistics: exact f32 VPU multiplies + sublane reductions.
    # (Kernel is memory-bound; MXU would add nothing but bf16 rounding.)
    aw = attn[:, :, None]                                     # (Bt, T, 1)
    xw = x * aw                                               # (Bt, T, C)
    s1 = jnp.sum(xw, axis=1)                                  # (Bt, C)
    s2 = jnp.sum(x * xw, axis=1)                              # (Bt, C)

    mean = s1 * (1.0 / T)                                     # torch.mean over T
    var = s2 - mean * mean                                    # faithful to module
    out = jnp.concatenate([mean, var], axis=-1)               # (Bt, 2*C)
    o_ref[...] = out.astype(o_ref.dtype)                      # one dense store


def _pick_block_b(B, max_bt=64):
    # Largest divisor of B that is a multiple of 8 (sublane-dense output block)
    # and <= max_bt; falls back to the whole batch for small / odd B.
    for bt in range(min(B, max_bt), 0, -1):
        if B % bt == 0 and (bt % 8 == 0 or bt == B):
            return bt
    return B


def attentive_statistics_pooling(x, w, b, v, *, block_b=None):
    """x: (B, T, C); w: (C, R) (= PyTorch Linear weight^T); b: (R,); v: (R,).

    Returns (B, 2*C) = concat([mean, variance], -1).
    """
    B, T, C = x.shape

    w32 = w.astype(jnp.float32)
    b32 = b.astype(jnp.float32)
    v32 = v.astype(jnp.float32)

    # Exact algebraic fold of the attention projection, done with elementwise
    # f32 math (no default-precision matvec):
    #   tanh((x @ W + b) @ v) == tanh(x @ (W @ v) + b @ v)
    wv = jnp.sum(w32 * v32[None, :], axis=1).reshape(1, C)    # (1, C)
    bv = jnp.sum(b32 * v32).reshape(1, 1)                     # (1, 1)

    if block_b is None:
        block_b = _pick_block_b(B)
    assert B % block_b == 0, (B, block_b)
    grid = (B // block_b,)

    kernel = functools.partial(_asp_kernel, T=T, C=C)
    return pl.pallas_call(
        kernel,
        out_shape=jax.ShapeDtypeStruct((B, 2 * C), x.dtype),
        grid_spec=pltpu.PrefetchScalarGridSpec(
            num_scalar_prefetch=0,
            grid=grid,
            in_specs=[
                pl.BlockSpec((block_b, T, C), lambda i: (i, 0, 0)),
                pl.BlockSpec((1, C), lambda i: (0, 0)),
                pl.BlockSpec((1, 1), lambda i: (0, 0)),
            ],
            out_specs=pl.BlockSpec((block_b, 2 * C), lambda i: (i, 0)),
        ),
        compiler_params=pltpu.CompilerParams(
            dimension_semantics=("parallel",)),
    )(x, wv, bv)


def _reference(x, w, b, v):
    # Pure-JAX reference mirroring the PyTorch module (unfolded projection).
    # Matmuls at highest precision so the comparison isn't dominated by the
    # reference's own bf16 MXU rounding.
    lin = jnp.einsum("btc,cr->btr", x, w, precision="highest") + b
    scores = jnp.tanh(jnp.einsum("btr,r->bt", lin, v, precision="highest"))
    attn = jax.nn.softmax(scores, axis=1)                     # (B, T)
    wx = x * attn[:, :, None]
    mean = jnp.mean(wx, axis=1)
    var = jnp.sum(x * wx, axis=1) - mean * mean
    return jnp.concatenate([mean, var], axis=1)


if __name__ == "__main__":
    # Small shapes consistent with the module (channel=C, R_dim_self_att=R).
    B, T, C, R = 16, 16, 32, 16

    key = jax.random.PRNGKey(0)
    kx, kw, kb, kv = jax.random.split(key, 4)
    x = jax.random.normal(kx, (B, T, C), dtype=jnp.float32)
    # Linear weight stored as (C, R) = W^T of the PyTorch nn.Linear weight.
    w = jax.random.normal(kw, (C, R), dtype=jnp.float32) * 0.1
    b = jax.random.normal(kb, (R,), dtype=jnp.float32) * 0.1
    v = jax.random.normal(kv, (R,), dtype=jnp.float32)

    out = attentive_statistics_pooling(x, w, b, v, block_b=8)
    out = jax.block_until_ready(out)

    ref = _reference(x, w, b, v)
    assert out.shape == (B, 2 * C)
    assert jnp.allclose(out, ref, atol=2e-3, rtol=2e-3), (
        "mismatch vs reference, max abs err = "
        f"{jnp.max(jnp.abs(out - ref))}")
    print("KERNEL_OK")
</pallas_src>

<mosaic_0001>
module attributes {stable_mosaic.version = 11 : i64} {
  func.func @_asp_kernel(%arg0: i32, %arg1: memref<8x16x32xf32, #tpu.memory_space<vmem>>, %arg2: memref<1x32xf32, #tpu.memory_space<vmem>>, %arg3: memref<1x1xf32, #tpu.memory_space<vmem>>, %arg4: memref<8x64xf32, #tpu.memory_space<vmem>>) attributes {dimension_semantics = [#tpu.dimension_semantics<parallel>], iteration_bounds = array<i64: 2>, scalar_prefetch = 0 : i64, scratch_operands = 0 : i64, tpu.core_type = #tpu.core_type<tc>, window_params = [{transform_indices = @transform_0, window_bounds = array<i64: 8, 16, 32>}, {pipeline_mode = #tpu.pipeline_mode<synchronous>, transform_indices = @transform_1, window_bounds = array<i64: 1, 32>}, {pipeline_mode = #tpu.pipeline_mode<synchronous>, transform_indices = @transform_2, window_bounds = array<i64: 1, 1>}, {transform_indices = @transform_3, window_bounds = array<i64: 8, 64>}]} {
    %c0 = arith.constant 0 : index
    %c0_0 = arith.constant 0 : index
    %c0_1 = arith.constant 0 : index
    %0 = vector.load %arg1[%c0, %c0_0, %c0_1] : memref<8x16x32xf32, #tpu.memory_space<vmem>>, vector<8x16x32xf32>
    %c0_2 = arith.constant 0 : index
    %c0_3 = arith.constant 0 : index
    %1 = vector.load %arg2[%c0_2, %c0_3] : memref<1x32xf32, #tpu.memory_space<vmem>>, vector<1x32xf32>
    %c0_4 = arith.constant 0 : index
    %c0_5 = arith.constant 0 : index
    %2 = vector.load %arg3[%c0_4, %c0_5] : memref<1x1xf32, #tpu.memory_space<vmem>>, vector<1x1xf32>
    %3 = vector.shape_cast %1 : vector<1x32xf32> to vector<1x1x32xf32>
    %4 = vector.broadcast %3 : vector<1x1x32xf32> to vector<8x16x32xf32>
    %5 = arith.mulf %0, %4 : vector<8x16x32xf32>
    %cst = arith.constant dense<0.000000e+00> : vector<8x16xf32>
    %6 = vector.multi_reduction <add>, %5, %cst [2] : vector<8x16x32xf32> to vector<8x16xf32>
    %7 = vector.broadcast %2 : vector<1x1xf32> to vector<8x16xf32>
    %8 = arith.addf %6, %7 : vector<8x16xf32>
    %9 = math.tanh %8 : vector<8x16xf32>
    %cst_6 = arith.constant dense<0xFF800000> : vector<8xf32>
    %10 = vector.multi_reduction <maximumf>, %9, %cst_6 [1] : vector<8x16xf32> to vector<8xf32>
    %11 = vector.shape_cast %10 : vector<8xf32> to vector<8x1xf32>
    %12 = vector.broadcast %11 : vector<8x1xf32> to vector<8x16xf32>
    %13 = arith.subf %9, %12 : vector<8x16xf32>
    %14 = math.exp %13 : vector<8x16xf32>
    %cst_7 = arith.constant dense<0.000000e+00> : vector<8xf32>
    %15 = vector.multi_reduction <add>, %14, %cst_7 [1] : vector<8x16xf32> to vector<8xf32>
    %16 = vector.shape_cast %15 : vector<8xf32> to vector<8x1xf32>
    %17 = vector.broadcast %16 : vector<8x1xf32> to vector<8x16xf32>
    %18 = arith.divf %14, %17 : vector<8x16xf32>
    %19 = vector.shape_cast %18 : vector<8x16xf32> to vector<8x16x1xf32>
    %20 = vector.broadcast %19 : vector<8x16x1xf32> to vector<8x16x32xf32>
    %21 = arith.mulf %0, %20 : vector<8x16x32xf32>
    %cst_8 = arith.constant dense<0.000000e+00> : vector<8x32xf32>
    %22 = vector.multi_reduction <add>, %21, %cst_8 [1] : vector<8x16x32xf32> to vector<8x32xf32>
    %23 = arith.mulf %0, %21 : vector<8x16x32xf32>
    %cst_9 = arith.constant dense<0.000000e+00> : vector<8x32xf32>
    %24 = vector.multi_reduction <add>, %23, %cst_9 [1] : vector<8x16x32xf32> to vector<8x32xf32>
    %cst_10 = arith.constant 6.250000e-02 : f32
    %25 = vector.broadcast %cst_10 : f32 to vector<8x32xf32>
    %26 = arith.mulf %22, %25 : vector<8x32xf32>
    %27 = arith.mulf %26, %26 : vector<8x32xf32>
    %28 = arith.subf %24, %27 : vector<8x32xf32>
    %29 = tpu.concatenate %26, %28 in 1 : vector<8x32xf32>, vector<8x32xf32> -> vector<8x64xf32>
    %c0_11 = arith.constant 0 : index
    %c0_12 = arith.constant 0 : index
    %30 = vector.load %arg4[%c0_11, %c0_12] : memref<8x64xf32, #tpu.memory_space<vmem>>, vector<8x64xf32>
    tpu.vector_store %arg4[%c0_11, %c0_12], %29 {strides = array<i32>} : memref<8x64xf32, #tpu.memory_space<vmem>>, vector<8x64xf32>,
    return
  }
  func.func @transform_0(%arg0: i32) -> (i32, i32, i32) {
    %c0_i32 = arith.constant 0 : i32
    %c0_i32_0 = arith.constant 0 : i32
    %c0_i32_1 = arith.constant 0 : i32
    return %arg0, %c0_i32, %c0_i32_0 : i32, i32, i32
  }
  func.func @transform_1(%arg0: i32) -> (i32, i32) {
    %c0_i32 = arith.constant 0 : i32
    %c0_i32_0 = arith.constant 0 : i32
    %c0_i32_1 = arith.constant 0 : i32
    return %c0_i32, %c0_i32_0 : i32, i32
  }
  func.func @transform_2(%arg0: i32) -> (i32, i32) {
    %c0_i32 = arith.constant 0 : i32
    %c0_i32_0 = arith.constant 0 : i32
    %c0_i32_1 = arith.constant 0 : i32
    return %c0_i32, %c0_i32_0 : i32, i32
  }
  func.func @transform_3(%arg0: i32) -> (i32, i32) {
    %c0_i32 = arith.constant 0 : i32
    %c0_i32_0 = arith.constant 0 : i32
    return %arg0, %c0_i32 : i32, i32
  }
}

</mosaic_0001>

<bundles_post_ra>
// kernel: tpu_custom_call.1
= control target key start
LH: loop header
LB: loop body
LE: loop exit
PB: predicated region body
PF: predicated region fallthrough
CT: control target
= control target key end

     0   :  { %s2001_s0 = inlined_call_operand.hbm [shape: f32[16,16,32], index: 0, kind: input, shape index: {}]   ;;  %s2002_s1 = inlined_call_operand.vmem [shape: f32[1,32], index: 1, kind: input, shape index: {}]   ;;  %s2003_s2 = inlined_call_operand.<no memory space> [shape: f32[1,1], index: 2, kind: input, shape index: {}]   ;;  %s2004_s3 = inlined_call_operand.hbm [shape: f32[16,64], index: 3, kind: output, shape index: {}]  }
   0x1   :  { %v8_v0 = vstv %s2003_s2 }
   0x2   :  { %9 = vst [vmem:[#allocation2] sm:$0x1] %v8_v0 }
   0x3   :  { %10 = vsyncpa [#allocation4], 0 }
   0x4   :  { %12 = vsyncpa [#allocation4 + $0x1], 0 }
   0x5   :  { %13 = vsyncpa [#allocation5], 0 }
   0x6   :  { %15 = vsyncpa [#allocation5 + $0x1], 0  ;;  %s1413_s14 = smov 0   ;;  %s1415_s15 = smov 0  }
   0x7   :  { %s1417_s16 = smov 0   ;;  %s1419_s17 = smov 0  }
   0x8 LB: > { %s1434_s2 = sadd.s32 4294967295, %s1382_s17   ;;  %s1136_s18 = sadd.s32 4294967294, %s1382_s17   ;;  %s1382_s17 = sphi %s1419_s17, %s2023_s17   ;;  %s1378_s16 = sphi %s1417_s16, %s2022_s16   ;;  %s1374_s15 = sphi %s1415_s15, %s2021_s15   ;;  %s1370_s14 = sphi %s1413_s14, %s2020_s14  }
   0x9   : > { %s1438_s19 = sadd.s32 1, %s1382_s17   ;;  %s28_s20 = sadd.s32 1, %s1378_s16 }
   0xa   : > { %s25_s21 = ssub.s32 %s1382_s17, %s1438_s19  ;;  %p35_p0 = scmp.ne.s32.totalorder %s1378_s16, %s1374_s15 }
   0xb   : > { %p26_p1 = scmp.eq.s32.totalorder %s25_s21, 0  ;;  %p36_p2 = scmp.eq.s32.totalorder %s1382_s17, 0 }
   0xc   : > { %p41_p3 = scmp.ne.s32.totalorder %s1374_s15, %s1370_s14  ;;  %p42_p4 = scmp.eq.s32.totalorder %s1434_s2, 0 }
   0xd   : > { %s1450_s22 = scalar_select %p26_p1, %s1378_s16, %s28_s20  }
   0xe   : > { %p1452_p5 = por %p36_p2, %p35_p0  ;;  %p1456_p6 = por %p42_p4, %p41_p3 }
   0xf   : > { %p107_p7 = scmp.eq.s32.totalorder %s1434_s2, 1  ;;  %p113_p8 = scmp.eq.s32.totalorder %s1136_s18, 1 }
  0x10   : > { %p1166_p10 = scmp.lt.s32.totalorder %s1382_s17, 2  ;;  %s139_s27 = sand.u32 1, %s1378_s16  }
  0x11   : > { %p1463_p11 = por %p107_p7, %p35_p0  ;;  %p1467_p12 = por %p113_p8, %p41_p3 }
  0x12   : > { %s1153_s28 = sshll.u32 %s1382_s17, 11  ;;  %s1139_s29 = sshll.u32 %s139_s27, 7 }
  0x13   : > { %s2011_s25 = scalar_select %p1463_p11, 1, 0 }
  0x14   : > { %s2012_s26 = scalar_select %p1467_p12, 1, 0 }
  0x15   : > { %s1476_s5 = scalar_lea.hbm %s2001_s0, %s1153_s28  ;;  %s143_s6 = scalar_lea.vmem [#allocation3], %s1139_s29 }
  0x16   : > { %s151_s7 = sshll.u32 %s143_s6, 4  ;;  %p1480_p13 = pnand %p1166_p10, %p1452_p5  ;;  %s1484_s7 = int_to_ptr.vmem [resolvable:$true] %s151_s7 }
  0x17   : > { %s1486_s9 = scalar_lea.sflag [#allocation4], %s139_s27  ;;  %s1286_s10 = scalar_lea.hbm %s1476_s5, 2048 }
  0x18   : > { %p1287_p0 = scmp.ne.s32.totalorder %s1476_s5, %s1286_s10  ;;  %p1288_p1 = pneg %p1480_p13 }
  0x19   : > { %s1291_s13 = scalar_lea.hbm %s2001_s0, 4096  ;;  %p1292_p4 = scmp.lt.u32.totalorder %s1476_s5, %s2001_s0 }
  0x1a   : > { %p1289_p2 = pnand %p1288_p1, %p1287_p0  ;;  %p1293_p5 = scmp.lt.u32.totalorder %s1291_s13, %s1286_s10 }
  0x1b   : > { %p1295_p8 = scmp.lt.u32.totalorder %s1286_s10, %s1476_s5 }
  0x1c   : > { %p1290_p3 = pneg %p1289_p2  ;;  %p1294_p7 = por %p1293_p5, %p1292_p4 }
  0x1e   : > { %p1296_p10 = por %p1295_p8, %p1294_p7 }
  0x20   : > { %p1297_p9 = pnand %p1296_p10, %p1290_p3 }
  0x22   : > { %1300 = shalt.err (!%p1297_p9)
}
  0x23   : > { %s1301_s21 = scalar_lea.vmem %s1484_s7, 2048  ;;  %s1384_s23 = smov [#allocation3]  }
  0x24   : > { %p1302_p0 = scmp.ne.s32.totalorder %s1484_s7, %s1301_s21  ;;  %s1306_s27 = sshll.u32 %s1384_s23, 4  ;;  %s1307_s27 = int_to_ptr.vmem [resolvable:$false] %s1306_s27 }
  0x25   : > { %s1308_s28 = scalar_lea.vmem %s1307_s27, 4096  ;;  %p1309_p11 = scmp.lt.s32.totalorder %s1484_s7, %s1307_s27 }
  0x26   : > { %p1304_p2 = pnand %p1302_p0, %p1288_p1  ;;  %p1310_p4 = scmp.lt.s32.totalorder %s1308_s28, %s1301_s21 }
  0x28   : > { %p1305_p12 = pneg %p1304_p2  ;;  %p1311_p5 = por %p1310_p4, %p1309_p11 }
  0x2a   : > { %p1312_p7 = pnand %p1311_p5, %p1305_p12 }
  0x2c   : > { %1315 = shalt.err (!%p1312_p7)
}
  0x2d   : > { %s1385_s29 = smov 128   ;;  %s1386_s30 = smov 8  }
  0x2e   : > { %1161 = dma.hbm_to_vmem [thread:$0]  (!%p1480_p13), %s1476_s5, 2048, %s1484_s7, %s1486_s9, %s1385_s29, %s1385_s29, %s1386_s30  }
  0x2f   : > { %p1143_p9 = scmp.ge.s32.totalorder %s1382_s17, 1  ;;  %p159_p1 = scmp.lt.s32.totalorder %s1382_s17, 3 }
  0x31   : > { %p160_p3 = pnand %p1143_p9, %p159_p1 }
  0x32   : > { %s1517_s4 = sand.u32 (!%p160_p3), 1, %s1374_s15  }
  0x33   : > { %163 = sbr.rel (%p160_p3) target bundleno = 1098 (0x44a), region = 32  ;;  %s1144_s6 = sshll.u32 (!%p160_p3), %s1517_s4, 7 }
  0x34   : > { %s166_s10 = scalar_lea.sflag (!%p160_p3), [#allocation4], %s1517_s4  ;;  %s1521_s11 = scalar_lea.vmem (!%p160_p3), [#allocation3], %s1144_s6 }
  0x3a   : > { %1361 = dma.done.wait (%p1456_p6), %s166_s10, 2048  }
  0x3b   : > { %1363 = vsyncadd (%p1456_p6), %s166_s10, 4294965248  ;;  %v1387_v1 = vmov 0   ;;  %v1528_v2 = vld [vmem:[%s1521_s11] sm:$0xff]  ;;  %v1146_v3 = vld [vmem:[%s2002_s1] ss:$0 sm:$0xff]  ;;  %vm233_vm0 = vcmask 261120  }
  0x3c   : > { %1204 = vset.pattern.permute.xlu0 %v1387_v1  ;;  %1205 = vset.pattern.permute.xlu1 %v1387_v1  ;;  %v1534_v4 = vld [vmem:[%s1521_s11 + $0x8] sm:$0xff]  ;;  %v217_v5 = vmul.f32 %v1146_v3, %v1528_v2  ;;  %v1539_v7 = vld [vmem:[%s1521_s11 + $0x10] sm:$0xff]  ;;  %v1542_v8 = vld [vmem:[%s1521_s11 + $0x18] sm:$0xff]  ;;  %vm350_vm1 = vcmask 130112   ;;  %vm415_vm2 = vcmask 1041409   ;;  %vm417_vm3 = vcmask 1042434  }
  0x3d   : > { %v218_v6 = vmul.f32 %v1146_v3, %v1534_v4  ;;  %v219_v9 = vmul.f32 %v1146_v3, %v1539_v7  ;;  %v1546_v10 = vld [vmem:[%s1521_s11 + $0x20] sm:$0xff]  ;;  %v220_v11 = vmul.f32 %v1146_v3, %v1542_v8  ;;  %v1551_v13 = vld [vmem:[%s1521_s11 + $0x28] sm:$0xff]  ;;  %v1558_v18 = vld [vmem:[%s1521_s11 + $0x30] sm:$0xff]  ;;  %vm419_vm4 = vcmask 1043459   ;;  %s1388_s24 = smov 32   ;;  %s1145_s8 = sshll.u32 %s1517_s4, 3 }
  0x3e   : > { %v234_v12 = vsel %vm233_vm0, %v217_v5, 0.0  ;;  %v221_v16 = vmul.f32 %v1146_v3, %v1546_v10  ;;  %v222_v19 = vmul.f32 %v1146_v3, %v1551_v13  ;;  %v1562_v20 = vld [vmem:[%s1521_s11 + $0x38] sm:$0xff]  ;;  %v223_v22 = vmul.f32 %v1146_v3, %v1558_v18  ;;  %v1568_v24 = vld [vmem:[%s1521_s11 + $0x40] sm:$0xff]  ;;  %v1572_v26 = vld [vmem:[%s1521_s11 + $0x48] sm:$0xff]  ;;  %s1149_s9 = sshll.u32 %s1434_s2, 7  ;;  %s191_s12 = scalar_lea.vmem [#allocation6], %s1145_s8 }
  0x3f   : > { %235 = vadd.xlane.f32.xlu0 %v234_v12  ;;  %v240_v14 = vsel %vm233_vm0, %v219_v9, 0.0  ;;  %v237_v15 = vsel %vm233_vm0, %v218_v6, 0.0  ;;  %v243_v17 = vsel %vm233_vm0, %v220_v11, 0.0  ;;  %v224_v25 = vmul.f32 %v1146_v3, %v1562_v20  ;;  %v1578_v30 = vld [vmem:[%s1521_s11 + $0x50] sm:$0xff]  ;;  %v1582_v32 = vld [vmem:[%s1521_s11 + $0x58] sm:$0xff]  ;;  %v1588_v36 = vld [vmem:[%s1521_s11 + $0x60] sm:$0xff]  ;;  %s1956_s21 = scalar_lea.hbm %s2004_s3, %s1149_s9 }
  0x40   : > { %241 = vadd.xlane.f32.xlu1 %v240_v14  ;;  %v246_v21 = vsel %vm233_vm0, %v221_v16, 0.0  ;;  %v249_v23 = vsel %vm233_vm0, %v222_v19, 0.0  ;;  %v252_v27 = vsel %vm233_vm0, %v223_v22, 0.0  ;;  %v225_v28 = vmul.f32 %v1146_v3, %v1568_v24  ;;  %v1592_v38 = vld [vmem:[%s1521_s11 + $0x68] sm:$0xff]  ;;  %v1598_v42 = vld [vmem:[%s1521_s11 + $0x70] sm:$0xff]  ;;  %v1602_v44 = vld [vmem:[%s1521_s11 + $0x78] sm:$0xff] }
  0x41   : > { %v255_v29 = vsel %vm233_vm0, %v224_v25, 0.0  ;;  %v226_v31 = vmul.f32 %v1146_v3, %v1572_v26  ;;  %v227_v34 = vmul.f32 %v1146_v3, %v1578_v30  ;;  %v228_v37 = vmul.f32 %v1146_v3, %v1582_v32  ;;  %v1147_v51 = vld [vmem:[#allocation2] ss:$0 sm:$0xff]  ;;  %s1066_s13 = sshll.u32 %s191_s12, 4  ;;  %s1053_s23 = scalar_lea.sflag [#allocation5], %s1517_s4  ;;  %s1958_s13 = int_to_ptr.vmem [resolvable:$true] %s1066_s13 }
  0x42   : > { %v258_v33 = vsel %vm233_vm0, %v225_v28, 0.0  ;;  %v229_v40 = vmul.f32 %v1146_v3, %v1588_v36  ;;  %v230_v43 = vmul.f32 %v1146_v3, %v1592_v38  ;;  %v231_v46 = vmul.f32 %v1146_v3, %v1598_v42  ;;  %s1316_s27 = scalar_lea.vmem %s1958_s13, 128  ;;  %p2017_p11 = scmp.ne.s32.totalorder %s2011_s25, 0 }
  0x43   : > { %238 = vadd.xlane.f32.xlu0 %v237_v15  ;;  %v261_v35 = vsel %vm233_vm0, %v226_v31, 0.0  ;;  %v264_v39 = vsel %vm233_vm0, %v227_v34, 0.0  ;;  %v267_v41 = vsel %vm233_vm0, %v228_v37, 0.0  ;;  %v232_v48 = vmul.f32 %v1146_v3, %v1602_v44  ;;  %p1317_p6 = scmp.ne.s32.totalorder %s1958_s13, %s1316_s27  ;;  %s1389_s2 = smov [#allocation6]  }
  0x44   : > { %244 = vadd.xlane.f32.xlu1 %v243_v17  ;;  %v270_v45 = vsel %vm233_vm0, %v229_v40, 0.0  ;;  %v273_v47 = vsel %vm233_vm0, %v230_v43, 0.0  ;;  %v276_v49 = vsel %vm233_vm0, %v231_v46, 0.0  ;;  %v339_v6 = vlaneseq  ;;  %s1320_s28 = sshll.u32 %s1389_s2, 4  ;;  %s1321_s28 = int_to_ptr.vmem [resolvable:$false] %s1320_s28 }
  0x45   : > { %v279_v50 = vsel %vm233_vm0, %v232_v48, 0.0  ;;  %vm421_vm5 = vcmask 1044484   ;;  %vm423_vm6 = vcmask 1045509   ;;  %vm425_vm7 = vcmask 1046534   ;;  %p1318_p12 = pnand %p1317_p6, %p2017_p11  ;;  %s1322_s29 = scalar_lea.vmem %s1321_s28, 256 }
  0x46   : > { %v340_v15 = vand.u32 127, %v339_v6  ;;  %v1610_v22 = vshrl.u32 %v339_v6, 7  ;;  %vm427_vm8 = vcmask 1047559   ;;  %vm430_vm9 = vcmask 130048   ;;  %p1323_p8 = scmp.lt.s32.totalorder %s1958_s13, %s1321_s28  ;;  %p1324_p10 = scmp.lt.s32.totalorder %s1322_s29, %s1316_s27 }
  0x47   : > { %247 = vadd.xlane.f32.xlu0 %v246_v21  ;;  %vm1050_vm10 = vcmask 523264   ;;  %p1319_p13 = pneg %p1318_p12 }
  0x48   : > { %250 = vadd.xlane.f32.xlu1 %v249_v23  ;;  %v345_v25 = vadd.s32 4294967288, %v340_v15  ;;  %v1613_v31 = vsub.s32 %v340_v15, %v1610_v22  ;;  %p1325_p0 = por %p1324_p10, %p1323_p8 }
  0x4a   : > { %p1326_p2 = pnand %p1325_p0, %p1319_p13 }
  0x4b   : > { %253 = vadd.xlane.f32.xlu0 %v252_v27 }
  0x4c   : > { %256 = vadd.xlane.f32.xlu1 %v255_v29 }
  0x4f   : > { %259 = vadd.xlane.f32.xlu0 %v258_v33 }
  0x50   : > { %262 = vadd.xlane.f32.xlu1 %v261_v35  ;;  %v1616_v35 = vsub.s32 %v345_v25, %v1610_v22 }
  0x53   : > { %265 = vadd.xlane.f32.xlu0 %v264_v39 }
  0x54   : > { %268 = vadd.xlane.f32.xlu1 %v267_v41 }
  0x57   : > { %271 = vadd.xlane.f32.xlu0 %v270_v45 }
  0x58   : > { %274 = vadd.xlane.f32.xlu1 %v273_v47 }
  0x5b   : > { %277 = vadd.xlane.f32.xlu0 %v276_v49 }
  0x5c   : > { %280 = vadd.xlane.f32.xlu1 %v279_v50 }
  0x71   : > { %288 = vperm.xlu0 %1204, %v1147_v51  }
  0xcc   : > { %v236_v52 = vpop.xlane.xlu0 %235 }
  0xcd   : > { %v242_v54 = vpop.xlane.xlu1 %241 }
  0xd0   : > { %v239_v53 = vpop.xlane.xlu0 %238 }
  0xd1   : > { %v245_v57 = vpop.xlane.xlu1 %244 }
  0xd4   : > { %v248_v55 = vpop.xlane.xlu0 %247 }
  0xd5   : > { %v251_v59 = vpop.xlane.xlu1 %250 }
  0xd8   : > { %v254_v56 = vpop.xlane.xlu0 %253 }
  0xd9   : > { %v257_v61 = vpop.xlane.xlu1 %256 }
  0xdc   : > { %v260_v58 = vpop.xlane.xlu0 %259 }
  0xdd   : > { %v263_v63 = vpop.xlane.xlu1 %262 }
  0xe0   : > { %v266_v60 = vpop.xlane.xlu0 %265 }
  0xe1   : > { %v269_v3 = vpop.xlane.xlu1 %268 }
  0xe4   : > { %v272_v62 = vpop.xlane.xlu0 %271 }
  0xe5   : > { %v275_v17 = vpop.xlane.xlu1 %274 }
  0xe8   : > { %v278_v0 = vpop.xlane.xlu0 %277 }
  0xe9   : > { %v281_v33 = vpop.xlane.xlu1 %280 }
  0xf0   : > { %v289_v1 = vpop.permute.xlu0 %288 }
  0xf1   : > { %v291_v5 = vadd.f32 %v289_v1, %v236_v52  ;;  %v292_v9 = vadd.f32 %v289_v1, %v239_v53  ;;  %v293_v11 = vadd.f32 %v289_v1, %v242_v54  ;;  %v294_v12 = vadd.f32 %v289_v1, %v245_v57 }
  0xf2   : > { %v295_v14 = vadd.f32 %v289_v1, %v248_v55  ;;  %v296_v16 = vadd.f32 %v289_v1, %v251_v59  ;;  %v297_v19 = vadd.f32 %v289_v1, %v254_v56  ;;  %v298_v21 = vadd.f32 %v289_v1, %v257_v61 }
  0xf3   : > { %1206 = vtanh.f32 %v291_v5  ;;  %v299_v23 = vadd.f32 %v289_v1, %v260_v58  ;;  %v300_v27 = vadd.f32 %v289_v1, %v263_v63  ;;  %v301_v28 = vadd.f32 %v289_v1, %v266_v60 }
  0xf4   : > { %1208 = vtanh.f32 %v292_v9  ;;  %v302_v29 = vadd.f32 %v289_v1, %v269_v3  ;;  %v303_v34 = vadd.f32 %v289_v1, %v272_v62  ;;  %v304_v37 = vadd.f32 %v289_v1, %v275_v17 }
  0xf5   : > { %1210 = vtanh.f32 %v293_v11  ;;  %v305_v40 = vadd.f32 %v289_v1, %v278_v0  ;;  %v306_v43 = vadd.f32 %v289_v1, %v281_v33 }
  0xf6   : > { %1212 = vtanh.f32 %v294_v12 }
  0xf7   : > { %1214 = vtanh.f32 %v295_v14 }
  0xf8   : > { %1216 = vtanh.f32 %v296_v16 }
  0xf9   : > { %1218 = vtanh.f32 %v297_v19 }
  0xfa   : > { %1220 = vtanh.f32 %v298_v21 }
  0xfb   : > { %1222 = vtanh.f32 %v299_v23 }
  0xfc   : > { %1224 = vtanh.f32 %v300_v27 }
  0xfd   : > { %v1618_v39 = vpop.eup %1206  ;;  %1226 = vtanh.f32 %v301_v28 }
  0xfe   : > { %v1620_v41 = vpop.eup %1208  ;;  %1228 = vtanh.f32 %v302_v29  ;;  %v344_v45 = vrot.slane %v1618_v39, %v1613_v31 }
  0xff   : > { %v1624_v46 = vpop.eup %1210  ;;  %1230 = vtanh.f32 %v303_v34  ;;  %v349_v47 = vrot.slane %v1620_v41, %v1616_v35 }
 0x100   : > { %v1628_v48 = vpop.eup %1212  ;;  %1232 = vtanh.f32 %v304_v37  ;;  %v355_v49 = vrot.slane %v1624_v46, %v1613_v31 }
 0x101   : > { %v1632_v50 = vpop.eup %1214  ;;  %1234 = vtanh.f32 %v305_v40  ;;  %v351_v51 = vsel %vm350_vm1, %v349_v47, %v344_v45  ;;  %v359_v52 = vrot.slane %v1628_v48, %v1616_v35 }
 0x102   : > { %v1637_v53 = vpop.eup %1216  ;;  %1236 = vtanh.f32 %v306_v43  ;;  %v364_v54 = vrot.slane %v1632_v50, %v1613_v31 }
 0x103   : > { %v1641_v55 = vpop.eup %1218  ;;  %v360_v56 = vsel %vm350_vm1, %v359_v52, %v355_v49  ;;  %v368_v57 = vrot.slane %v1637_v53, %v1616_v35  ;;  %v2008_v52 = vsub.s32 3, %v1610_v22 }
 0x104   : > { %v1221_v58 = vpop.eup %1220  ;;  %v373_v59 = vrot.slane %v1641_v55, %v1613_v31  ;;  %v416_v60 = vsel %vm415_vm2, %v360_v56, %v351_v51  ;;  %v437_v51 = vsub.s32 0, %v1610_v22  ;;  %v441_v56 = vsub.s32 1, %v1610_v22 }
 0x105   : > { %v1649_v61 = vpop.eup %1222  ;;  %v369_v62 = vsel %vm350_vm1, %v368_v57, %v364_v54  ;;  %v377_v63 = vrot.slane %v1221_v58, %v1616_v35 }
 0x106   : > { %v1653_v0 = vpop.eup %1224  ;;  %v382_v1 = vrot.slane %v1649_v61, %v1613_v31  ;;  %v418_v3 = vsel %vm417_vm3, %v369_v62, %v416_v60  ;;  %v453_v60 = vsub.s32 4, %v1610_v22 }
 0x107   : > { %v1658_v5 = vpop.eup %1226  ;;  %v378_v6 = vsel %vm350_vm1, %v377_v63, %v373_v59  ;;  %v386_v9 = vrot.slane %v1653_v0, %v1616_v35 }
 0x108   : > { %v1663_v11 = vpop.eup %1228  ;;  %v391_v12 = vrot.slane %v1658_v5, %v1613_v31  ;;  %v420_v14 = vsel %vm419_vm4, %v378_v6, %v418_v3  ;;  %v2007_v6 = vsub.s32 5, %v1610_v22 }
 0x109   : > { %v1668_v15 = vpop.eup %1230  ;;  %v387_v16 = vsel %vm350_vm1, %v386_v9, %v382_v1  ;;  %v395_v17 = vrot.slane %v1663_v11, %v1616_v35 }
 0x10a   : > { %v1673_v19 = vpop.eup %1232  ;;  %v400_v21 = vrot.slane %v1668_v15, %v1613_v31  ;;  %v422_v23 = vsel %vm421_vm5, %v387_v16, %v420_v14  ;;  %v445_v14 = vsub.s32 2, %v1610_v22 }
 0x10b   : > { %v1678_v25 = vpop.eup %1234  ;;  %v396_v27 = vsel %vm350_vm1, %v395_v17, %v391_v12  ;;  %v404_v28 = vrot.slane %v1673_v19, %v1616_v35  ;;  %v2006_v17 = vsub.s32 6, %v1610_v22 }
 0x10c   : > { %v1683_v29 = vpop.eup %1236  ;;  %v409_v33 = vrot.slane %v1678_v25, %v1613_v31  ;;  %v424_v34 = vsel %vm423_vm6, %v396_v27, %v422_v23 }
 0x10d   : > { %v405_v37 = vsel %vm350_vm1, %v404_v28, %v400_v21  ;;  %v413_v40 = vrot.slane %v1683_v29, %v1616_v35 }
 0x10e   : > { %v426_v43 = vsel %vm425_vm7, %v405_v37, %v424_v34 }
 0x10f   : > { %v414_v45 = vsel %vm350_vm1, %v413_v40, %v409_v33  ;;  %v465_v33 = vsub.s32 7, %v1610_v22 }
 0x110   : > { %v428_v47 = vsel %vm427_vm8, %v414_v45, %v426_v43 }
 0x111   : > { %v431_v49 = vsel %vm430_vm9, %v428_v47, -inf }
 0x112   : > { %432 = vmax.xlane.f32.xlu1 %v431_v49 }
 0x19f   : > { %v433_v54 = vpop.xlane.xlu1 %432 }
 0x1a0   : > { %v438_v57 = vrot.slane %v433_v54, %v437_v51  ;;  %v450_v62 = vrot.slane %v433_v54, %v2008_v52  ;;  %v442_v63 = vrot.slane %v433_v54, %v441_v56  ;;  %v454_v9 = vrot.slane %v433_v54, %v453_v60 }
 0x1a1   : > { %v458_v21 = vrot.slane %v433_v54, %v2007_v6  ;;  %v446_v27 = vrot.slane %v433_v54, %v445_v14 }
 0x1a2   : > { %v475_v59 = vsub.f32 %v1618_v39, %v438_v57  ;;  %v476_v1 = vsub.f32 %v1620_v41, %v438_v57  ;;  %v482_v12 = vsub.f32 %v1221_v58, %v450_v62  ;;  %v477_v39 = vsub.f32 %v1624_v46, %v442_v63 }
 0x1a3   : > { %v484_v41 = vsub.f32 %v1653_v0, %v454_v9  ;;  %v478_v28 = vsub.f32 %v1628_v48, %v442_v63  ;;  %v462_v46 = vrot.slane %v433_v54, %v2006_v17  ;;  %v486_v34 = vsub.f32 %v1663_v11, %v458_v21 }
 0x1a4   : > { %v491_v3 = vmul.f32 1.442695, %v475_v59  ;;  %v493_v16 = vmul.f32 1.442695, %v476_v1  ;;  %v505_v23 = vmul.f32 1.442695, %v482_v12  ;;  %v479_v40 = vsub.f32 %v1632_v50, %v446_v27 }
 0x1a5   : > { %v495_v58 = vmul.f32 1.442695, %v477_v39  ;;  %v509_v37 = vmul.f32 1.442695, %v484_v41  ;;  %v497_v0 = vmul.f32 1.442695, %v478_v28  ;;  %v466_v48 = vrot.slane %v433_v54, %v465_v33 }
 0x1a6   : > { %1238 = vpow2.f32 %v491_v3  ;;  %v488_v45 = vsub.f32 %v1673_v19, %v462_v46  ;;  %v513_v47 = vmul.f32 1.442695, %v486_v34  ;;  %v480_v49 = vsub.f32 %v1637_v53, %v446_v27 }
 0x1a7   : > { %1240 = vpow2.f32 %v493_v16  ;;  %v499_v11 = vmul.f32 1.442695, %v479_v40  ;;  %v490_v50 = vsub.f32 %v1683_v29, %v466_v48  ;;  %v481_v54 = vsub.f32 %v1641_v55, %v450_v62 }
 0x1a8   : > { %1242 = vpow2.f32 %v505_v23  ;;  %v517_v59 = vmul.f32 1.442695, %v488_v45  ;;  %v501_v19 = vmul.f32 1.442695, %v480_v49  ;;  %v483_v29 = vsub.f32 %v1649_v61, %v454_v9 }
 0x1a9   : > { %1244 = vpow2.f32 %v495_v58  ;;  %v521_v53 = vmul.f32 1.442695, %v490_v50  ;;  %v503_v3 = vmul.f32 1.442695, %v481_v54  ;;  %v485_v55 = vsub.f32 %v1658_v5, %v458_v21 }
 0x1aa   : > { %1246 = vpow2.f32 %v509_v37  ;;  %v507_v62 = vmul.f32 1.442695, %v483_v29  ;;  %v487_v61 = vsub.f32 %v1668_v15, %v462_v46  ;;  %v489_v5 = vsub.f32 %v1678_v25, %v466_v48 }
 0x1ab   : > { %1248 = vpow2.f32 %v497_v0  ;;  %v511_v9 = vmul.f32 1.442695, %v485_v55 }
 0x1ac   : > { %1250 = vpow2.f32 %v513_v47  ;;  %v515_v21 = vmul.f32 1.442695, %v487_v61  ;;  %v519_v15 = vmul.f32 1.442695, %v489_v5 }
 0x1ad   : > { %1252 = vpow2.f32 %v499_v11 }
 0x1ae   : > { %1254 = vpow2.f32 %v517_v59 }
 0x1af   : > { %1256 = vpow2.f32 %v501_v19 }
 0x1b0   : > { %v1724_v43 = vpop.eup %1238  ;;  %1258 = vpow2.f32 %v521_v53 }
 0x1b1   : > { %540 = vperm.xlu1 %1205, %v1724_v43   ;;  %v1731_v57 = vpop.eup %1240  ;;  %1260 = vpow2.f32 %v503_v3 }
 0x1b2   : > { %v1736_v63 = vpop.eup %1242  ;;  %1262 = vpow2.f32 %v507_v62 }
 0x1b3   : > { %v1738_v1 = vpop.eup %1244  ;;  %561 = vperm.xlu0 %1204, %v1736_v63   ;;  %1264 = vpow2.f32 %v511_v9 }
 0x1b4   : > { %v1743_v12 = vpop.eup %1246  ;;  %1266 = vpow2.f32 %v515_v21 }
 0x1b5   : > { %543 = vperm.xlu1 %1205, %v1731_v57   ;;  %v1745_v39 = vpop.eup %1248  ;;  %1268 = vpow2.f32 %v519_v15 }
 0x1b6   : > { %v1750_v16 = vpop.eup %1250 }
 0x1b7   : > { %567 = vperm.xlu0 %1204, %v1743_v12   ;;  %v1752_v41 = vpop.eup %1252 }
 0x1b8   : > { %v1757_v23 = vpop.eup %1254 }
 0x1b9   : > { %546 = vperm.xlu1 %1205, %v1738_v1   ;;  %v1759_v27 = vpop.eup %1256 }
 0x1ba   : > { %v1764_v28 = vpop.eup %1258 }
 0x1bb   : > { %573 = vperm.xlu0 %1204, %v1750_v16   ;;  %v1766_v58 = vpop.eup %1260 }
 0x1bc   : > { %v1770_v46 = vpop.eup %1262 }
 0x1bd   : > { %549 = vperm.xlu1 %1205, %v1745_v39   ;;  %v1773_v34 = vpop.eup %1264 }
 0x1be   : > { %v1776_v25 = vpop.eup %1266 }
 0x1bf   : > { %579 = vperm.xlu0 %1204, %v1757_v23   ;;  %v1779_v37 = vpop.eup %1268 }
 0x1c1   : > { %552 = vperm.xlu1 %1205, %v1752_v41  }
 0x1c3   : > { %585 = vperm.xlu0 %1204, %v1764_v28  }
 0x1c5   : > { %555 = vperm.xlu1 %1205, %v1759_v27  }
 0x1c9   : > { %558 = vperm.xlu1 %1205, %v1766_v58  }
 0x1cd   : > { %564 = vperm.xlu1 %1205, %v1770_v46  }
 0x1d1   : > { %570 = vperm.xlu1 %1205, %v1773_v34  }
 0x1d5   : > { %576 = vperm.xlu1 %1205, %v1776_v25  }
 0x1d9   : > { %582 = vperm.xlu1 %1205, %v1779_v37  }
 0x230   : > { %v541_v40 = vpop.permute.xlu1 %540 }
 0x231   : > { %v590_v17 = vrot.slane %v541_v40, %v1613_v31 }
 0x232   : > { %v562_v47 = vpop.permute.xlu0 %561 }
 0x233   : > { %v621_v15 = vrot.slane %v562_v47, %v1616_v35 }
 0x234   : > { %v544_v0 = vpop.permute.xlu1 %543 }
 0x235   : > { %v594_v62 = vrot.slane %v544_v0, %v1616_v35 }
 0x236   : > { %v568_v11 = vpop.permute.xlu0 %567 }
 0x238   : > { %v547_v48 = vpop.permute.xlu1 %546 }
 0x239   : > { %v599_v61 = vrot.slane %v547_v48, %v1613_v31  ;;  %v595_v48 = vsel %vm350_vm1, %v594_v62, %v590_v17 }
 0x23a   : > { %v574_v54 = vpop.permute.xlu0 %573 }
 0x23c   : > { %v550_v45 = vpop.permute.xlu1 %549 }
 0x23d   : > { %v603_v53 = vrot.slane %v550_v45, %v1616_v35 }
 0x23e   : > { %v580_v29 = vpop.permute.xlu0 %579 }
 0x23f   : > { %v604_v45 = vsel %vm350_vm1, %v603_v53, %v599_v61  ;;  %v648_v47 = vrot.slane %v580_v29, %v1616_v35 }
 0x240   : > { %v553_v49 = vpop.permute.xlu1 %552  ;;  %v659_v40 = vsel %vm415_vm2, %v604_v45, %v595_v48 }
 0x241   : > { %v608_v5 = vrot.slane %v553_v49, %v1613_v31 }
 0x242   : > { %v586_v53 = vpop.permute.xlu0 %585 }
 0x243   : > { %v657_v62 = vrot.slane %v586_v53, %v1616_v35 }
 0x244   : > { %v556_v50 = vpop.permute.xlu1 %555 }
 0x245   : > { %v612_v3 = vrot.slane %v556_v50, %v1616_v35  ;;  %v630_v50 = vrot.slane %v568_v11, %v1616_v35 }
 0x247   : > { %v613_v0 = vsel %vm350_vm1, %v612_v3, %v608_v5 }
 0x248   : > { %v559_v59 = vpop.permute.xlu1 %558  ;;  %v660_v11 = vsel %vm417_vm3, %v613_v0, %v659_v40 }
 0x249   : > { %v617_v9 = vrot.slane %v559_v59, %v1613_v31  ;;  %v639_v59 = vrot.slane %v574_v54, %v1616_v35 }
 0x24b   : > { %v622_v49 = vsel %vm350_vm1, %v621_v15, %v617_v9 }
 0x24c   : > { %v565_v19 = vpop.permute.xlu1 %564  ;;  %v661_v61 = vsel %vm419_vm4, %v622_v49, %v660_v11 }
 0x24d   : > { %v626_v21 = vrot.slane %v565_v19, %v1613_v31 }
 0x250   : > { %v571_v55 = vpop.permute.xlu1 %570 }
 0x251   : > { %v635_v6 = vrot.slane %v571_v55, %v1613_v31  ;;  %v631_v55 = vsel %vm350_vm1, %v630_v50, %v626_v21 }
 0x253   : > { %v640_v3 = vsel %vm350_vm1, %v639_v59, %v635_v6 }
 0x254   : > { %v577_v52 = vpop.permute.xlu1 %576 }
 0x255   : > { %v644_v19 = vrot.slane %v577_v52, %v1613_v31  ;;  %v662_v52 = vsel %vm421_vm5, %v631_v55, %v661_v61 }
 0x256   : > { %v663_v9 = vsel %vm423_vm6, %v640_v3, %v662_v52 }
 0x257   : > { %v649_v17 = vsel %vm350_vm1, %v648_v47, %v644_v19 }
 0x258   : > { %v583_v54 = vpop.permute.xlu1 %582  ;;  %v664_v21 = vsel %vm425_vm7, %v649_v17, %v663_v9 }
 0x259   : > { %v653_v29 = vrot.slane %v583_v54, %v1613_v31 }
 0x25b   : > { %v658_v5 = vsel %vm350_vm1, %v657_v62, %v653_v29 }
 0x25c   : > { %v665_v15 = vsel %vm427_vm8, %v658_v5, %v664_v21 }
 0x25d   : > { %v667_v6 = vsel %vm430_vm9, %v665_v15, 0.0 }
 0x25e   : > { %668 = vadd.xlane.f32.xlu1 %v667_v6 }
 0x2eb   : > { %v669_v45 = vpop.xlane.xlu1 %668 }
 0x2ec   : > { %v690_v50 = vrot.slane %v669_v45, %v453_v60  ;;  %v674_v35 = vrot.slane %v669_v45, %v437_v51  ;;  %v702_v31 = vrot.slane %v669_v45, %v465_v33  ;;  %v678_v0 = vrot.slane %v669_v45, %v441_v56 }
 0x2ed   : > { %v682_v60 = vrot.slane %v669_v45, %v445_v14  ;;  %v2014_v56 = vsub.s32 3, %v1610_v22 }
 0x2ee   : > { %1270 = vrcp.f32 %v690_v50 }
 0x2ef   : > { %1272 = vrcp.f32 %v674_v35  ;;  %v686_v53 = vrot.slane %v669_v45, %v2014_v56 }
 0x2f0   : > { %1274 = vrcp.f32 %v702_v31 }
 0x2f1   : > { %1276 = vrcp.f32 %v678_v0 }
 0x2f2   : > { %1278 = vrcp.f32 %v682_v60 }
 0x2f3   : > { %1280 = vrcp.f32 %v686_v53 }
 0x2f8   : > { %v1271_v48 = vpop.eup %1270 }
 0x2f9   : > { %v1273_v59 = vpop.eup %1272  ;;  %v725_v49 = vmul.f32 %v1271_v48, %v1743_v12 }
 0x2fa   : > { %v1275_v19 = vpop.eup %1274  ;;  %v712_v51 = vmul.f32 %v1273_v59, %v1724_v43  ;;  %v713_v47 = vmul.f32 %v1273_v59, %v1731_v57 }
 0x2fb   : > { %782 = vperm.xlu1 %1205, %v725_v49   ;;  %v733_v33 = vmul.f32 %v1275_v19, %v1779_v37  ;;  %v1277_v40 = vpop.eup %1276  ;;  %v2015_v37 = vsub.s32 5, %v1610_v22 }
 0x2fc   : > { %737 = vperm.xlu0 %1204, %v712_v51   ;;  %v715_v12 = vmul.f32 %v1277_v40, %v1738_v1  ;;  %v716_v14 = vmul.f32 %v1277_v40, %v1745_v39  ;;  %v1279_v43 = vpop.eup %1278  ;;  %v2016_v1 = vsub.s32 6, %v1610_v22 }
 0x2fd   : > { %v718_v55 = vmul.f32 %v1279_v43, %v1752_v41  ;;  %v694_v57 = vrot.slane %v669_v45, %v2015_v37  ;;  %v719_v11 = vmul.f32 %v1279_v43, %v1759_v27  ;;  %v1281_v3 = vpop.eup %1280  ;;  %v724_v41 = vmul.f32 %v1271_v48, %v1770_v46 }
 0x2fe   : > { %v721_v61 = vmul.f32 %v1281_v3, %v1766_v58  ;;  %v698_v17 = vrot.slane %v669_v45, %v2016_v1  ;;  %v722_v39 = vmul.f32 %v1281_v3, %v1736_v63  ;;  %v734_v63 = vmul.f32 %v1275_v19, %v1764_v28 }
 0x2ff   : > { %807 = vperm.xlu1 %1205, %v733_v33   ;;  %1282 = vrcp.f32 %v694_v57 }
 0x300   : > { %742 = vperm.xlu0 %1204, %v713_v47   ;;  %1284 = vrcp.f32 %v698_v17 }
 0x304   : > { %747 = vperm.xlu0 %1204, %v715_v12  }
 0x308   : > { %752 = vperm.xlu0 %1204, %v716_v14  }
 0x309   : > { %v1283_v54 = vpop.eup %1282 }
 0x30a   : > { %v727_v62 = vmul.f32 %v1283_v54, %v1773_v34  ;;  %v728_v27 = vmul.f32 %v1283_v54, %v1750_v16  ;;  %v1285_v52 = vpop.eup %1284 }
 0x30b   : > { %v730_v58 = vmul.f32 %v1285_v52, %v1776_v25  ;;  %v731_v22 = vmul.f32 %v1285_v52, %v1757_v23 }
 0x30c   : > { %757 = vperm.xlu0 %1204, %v718_v55  }
 0x310   : > { %762 = vperm.xlu0 %1204, %v719_v11  }
 0x314   : > { %767 = vperm.xlu0 %1204, %v721_v61  }
 0x318   : > { %772 = vperm.xlu0 %1204, %v722_v39  }
 0x31c   : > { %777 = vperm.xlu0 %1204, %v724_v41  }
 0x320   : > { %787 = vperm.xlu0 %1204, %v727_v62  }
 0x324   : > { %792 = vperm.xlu0 %1204, %v728_v27  }
 0x328   : > { %797 = vperm.xlu0 %1204, %v730_v58  }
 0x32c   : > { %802 = vperm.xlu0 %1204, %v731_v22  }
 0x330   : > { %812 = vperm.xlu0 %1204, %v734_v63  }
 0x37a   : > { %v783_v61 = vpop.permute.xlu1 %782 }
 0x37b   : > { %v738_v29 = vpop.permute.xlu0 %737  ;;  %v824_v52 = vmul.f32 %v783_v61, %v1572_v26 }
 0x37c   : > { %v815_v46 = vmul.f32 %v738_v29, %v1528_v2 }
 0x37e   : > { %v831_v5 = vsel %vm233_vm0, %v815_v46, 0.0  ;;  %v903_v51 = vmul.f32 %v815_v46, %v1528_v2 }
 0x37f   : > { %v743_v9 = vpop.permute.xlu0 %742 }
 0x380   : > { %v816_v34 = vmul.f32 %v743_v9, %v1534_v4 }
 0x382   : > { %v832_v16 = vsel %vm233_vm0, %v816_v34, 0.0  ;;  %v904_v49 = vmul.f32 %v816_v34, %v1534_v4  ;;  %v919_v4 = vsel %vm233_vm0, %v903_v51, 0.0 }
 0x383   : > { %v833_v21 = vadd.f32 %v832_v16, %v831_v5  ;;  %v748_v15 = vpop.permute.xlu0 %747  ;;  %v808_v16 = vpop.permute.xlu1 %807 }
 0x384   : > { %v817_v6 = vmul.f32 %v748_v15, %v1539_v7  ;;  %v920_v53 = vsel %vm233_vm0, %v904_v49, 0.0 }
 0x385   : > { %v834_v25 = vrot.slane %v833_v21, 4  ;;  %v921_v2 = vadd.f32 %v920_v53, %v919_v4 }
 0x386   : > { %v840_v35 = vsel %vm233_vm0, %v817_v6, 0.0  ;;  %v905_v3 = vmul.f32 %v817_v6, %v1539_v7 }
 0x387   : > { %v835_v23 = vadd.f32 %v834_v25, %v833_v21  ;;  %v753_v45 = vpop.permute.xlu0 %752  ;;  %v922_v58 = vrot.slane %v921_v2, 4 }
 0x388   : > { %v818_v28 = vmul.f32 %v753_v45, %v1542_v8  ;;  %v928_v22 = vsel %vm233_vm0, %v905_v3, 0.0 }
 0x389   : > { %v836_v50 = vrot.slane %v835_v23, 2  ;;  %v923_v45 = vadd.f32 %v922_v58, %v921_v2 }
 0x38a   : > { %v841_v31 = vsel %vm233_vm0, %v818_v28, 0.0  ;;  %v906_v14 = vmul.f32 %v818_v28, %v1542_v8 }
 0x38b   : > { %v842_v0 = vadd.f32 %v841_v31, %v840_v35  ;;  %v758_v48 = vpop.permute.xlu0 %757  ;;  %v837_v59 = vadd.f32 %v836_v50, %v835_v23  ;;  %v868_v23 = vsel %vm233_vm0, %v824_v52, 0.0  ;;  %v912_v35 = vmul.f32 %v824_v52, %v1572_v26 }
 0x38c   : > { %v819_v19 = vmul.f32 %v758_v48, %v1546_v10  ;;  %v929_v41 = vsel %vm233_vm0, %v906_v14, 0.0  ;;  %v924_v53 = vrot.slane %v923_v45, 2 }
 0x38d   : > { %v843_v60 = vrot.slane %v842_v0, 4  ;;  %v838_v56 = vrot.slane %v837_v59, 1  ;;  %v930_v7 = vadd.f32 %v929_v41, %v928_v22 }
 0x38e   : > { %v849_v43 = vsel %vm233_vm0, %v819_v19, 0.0  ;;  %v907_v49 = vmul.f32 %v819_v19, %v1546_v10  ;;  %v956_v19 = vsel %vm233_vm0, %v912_v35, 0.0 }
 0x38f   : > { %v844_v33 = vadd.f32 %v843_v60, %v842_v0  ;;  %v763_v47 = vpop.permute.xlu0 %762  ;;  %v839_v1 = vadd.f32 %v838_v56, %v837_v59  ;;  %v931_v31 = vrot.slane %v930_v7, 4  ;;  %v829_v59 = vmul.f32 %v808_v16, %v1598_v42 }
 0x390   : > { %v820_v40 = vmul.f32 %v763_v47, %v1551_v13 }
 0x391   : > { %v845_v12 = vrot.slane %v844_v33, 2  ;;  %v1869_v29 = vmul.f32 0.0625, %v839_v1  ;;  %v917_v4 = vmul.f32 %v829_v59, %v1598_v42  ;;  %v1902_v42 = vadd.f32 %v924_v53, %v923_v45 }
 0x392   : > { %v850_v55 = vsel %vm233_vm0, %v820_v40, 0.0  ;;  %v908_v28 = vmul.f32 %v820_v40, %v1551_v13  ;;  %v894_v45 = vsel %vm233_vm0, %v829_v59, 0.0 }
 0x393   : > { %v846_v37 = vadd.f32 %v845_v12, %v844_v33  ;;  %v851_v57 = vadd.f32 %v850_v55, %v849_v43  ;;  %v768_v11 = vpop.permute.xlu0 %767  ;;  %v932_v43 = vadd.f32 %v931_v31, %v930_v7 }
 0x394   : > { %v821_v8 = vmul.f32 %v768_v11, %v1558_v18  ;;  %v938_v26 = vsel %vm233_vm0, %v908_v28, 0.0 }
 0x395   : > { %v847_v17 = vrot.slane %v846_v37, 1  ;;  %v852_v39 = vrot.slane %v851_v57, 4  ;;  %v933_v41 = vrot.slane %v932_v43, 2 }
 0x396   : > { %v858_v34 = vsel %vm233_vm0, %v821_v8, 0.0  ;;  %v909_v47 = vmul.f32 %v821_v8, %v1558_v18  ;;  %v937_v18 = vsel %vm233_vm0, %v907_v49, 0.0  ;;  %v926_v49 = vrot.slane %v1902_v42, 1 }
 0x397   : > { %v848_v54 = vadd.f32 %v847_v17, %v846_v37  ;;  %v853_v62 = vadd.f32 %v852_v39, %v851_v57  ;;  %v773_v27 = vpop.permute.xlu0 %772  ;;  %v939_v57 = vadd.f32 %v938_v26, %v937_v18 }
 0x398   : > { %v822_v63 = vmul.f32 %v773_v27, %v1562_v20 }
 0x399   : > { %v1871_v46 = vmul.f32 0.0625, %v848_v54  ;;  %v854_v9 = vrot.slane %v853_v62, 2  ;;  %v940_v22 = vrot.slane %v939_v57, 4 }
 0x39a   : > { %v859_v5 = vsel %vm233_vm0, %v822_v63, 0.0  ;;  %v910_v60 = vmul.f32 %v822_v63, %v1562_v20 }
 0x39b   : > { %v1023_v21 = vsel %vm415_vm2, %v1871_v46, %v1869_v29  ;;  %v855_v15 = vadd.f32 %v854_v9, %v853_v62  ;;  %v860_v25 = vadd.f32 %v859_v5, %v858_v34  ;;  %v778_v6 = vpop.permute.xlu0 %777 }
 0x39c   : > { %v823_v50 = vmul.f32 %v778_v6, %v1568_v24  ;;  %v947_v37 = vsel %vm233_vm0, %v910_v60, 0.0 }
 0x39d   : > { %v856_v0 = vrot.slane %v855_v15, 1  ;;  %v861_v48 = vrot.slane %v860_v25, 4 }
 0x39e   : > { %v867_v51 = vsel %vm233_vm0, %v823_v50, 0.0  ;;  %v911_v12 = vmul.f32 %v823_v50, %v1568_v24  ;;  %v946_v24 = vsel %vm233_vm0, %v909_v47, 0.0  ;;  %v934_v47 = vadd.f32 %v933_v41, %v932_v43 }
 0x39f   : > { %v857_v33 = vadd.f32 %v856_v0, %v855_v15  ;;  %v862_v56 = vadd.f32 %v861_v48, %v860_v25  ;;  %v869_v13 = vadd.f32 %v868_v23, %v867_v51  ;;  %v788_v40 = vpop.permute.xlu0 %787  ;;  %v948_v54 = vadd.f32 %v947_v37, %v946_v24 }
 0x3a0   : > { %v825_v14 = vmul.f32 %v788_v40, %v1578_v30  ;;  %v955_v1 = vsel %vm233_vm0, %v911_v12, 0.0 }
 0x3a1   : > { %v1890_v55 = vmul.f32 0.0625, %v857_v33  ;;  %v863_v10 = vrot.slane %v862_v56, 2  ;;  %v870_v20 = vrot.slane %v869_v13, 4  ;;  %v957_v7 = vadd.f32 %v956_v19, %v955_v1 }
 0x3a2   : > { %v913_v17 = vmul.f32 %v825_v14, %v1578_v30  ;;  %v876_v27 = vsel %vm233_vm0, %v825_v14, 0.0  ;;  %v949_v15 = vrot.slane %v948_v54, 4 }
 0x3a3   : > { %v1024_v11 = vsel %vm417_vm3, %v1890_v55, %v1023_v21  ;;  %v864_v2 = vadd.f32 %v863_v10, %v862_v56  ;;  %v793_v3 = vpop.permute.xlu0 %792  ;;  %v871_v61 = vadd.f32 %v870_v20, %v869_v13  ;;  %v958_v50 = vrot.slane %v957_v7, 4 }
 0x3a4   : > { %v826_v39 = vmul.f32 %v793_v3, %v1582_v32  ;;  %v964_v5 = vsel %vm233_vm0, %v913_v17, 0.0  ;;  %v941_v56 = vadd.f32 %v940_v22, %v939_v57  ;;  %v950_v59 = vadd.f32 %v949_v15, %v948_v54 }
 0x3a5   : > { %v865_v8 = vrot.slane %v864_v2, 1  ;;  %v872_v62 = vrot.slane %v871_v61, 2  ;;  %v959_v12 = vadd.f32 %v958_v50, %v957_v7  ;;  %v935_v54 = vrot.slane %v934_v47, 1 }
 0x3a6   : > { %v877_v52 = vsel %vm233_vm0, %v826_v39, 0.0  ;;  %v914_v58 = vmul.f32 %v826_v39, %v1582_v32  ;;  %v982_v32 = vsel %vm233_vm0, %v917_v4, 0.0  ;;  %v942_v57 = vrot.slane %v941_v56, 2 }
 0x3a7   : > { %v866_v63 = vadd.f32 %v865_v8, %v864_v2  ;;  %v878_v9 = vadd.f32 %v877_v52, %v876_v27  ;;  %v798_v34 = vpop.permute.xlu0 %797  ;;  %v873_v30 = vadd.f32 %v872_v62, %v871_v61  ;;  %v951_v3 = vrot.slane %v950_v59, 2 }
 0x3a8   : > { %v965_v16 = vsel %vm233_vm0, %v914_v58, 0.0  ;;  %v827_v21 = vmul.f32 %v798_v34, %v1588_v36  ;;  %v960_v17 = vrot.slane %v959_v12, 2  ;;  %v943_v58 = vadd.f32 %v942_v57, %v941_v56 }
 0x3a9   : > { %v1910_v25 = vmul.f32 0.0625, %v866_v63  ;;  %v879_v6 = vrot.slane %v878_v9, 4  ;;  %v966_v23 = vadd.f32 %v965_v16, %v964_v5  ;;  %v874_v28 = vrot.slane %v873_v30, 1 }
 0x3aa   : > { %v915_v31 = vmul.f32 %v827_v21, %v1588_v36  ;;  %v885_v53 = vsel %vm233_vm0, %v827_v21, 0.0  ;;  %v927_v15 = vadd.f32 %v926_v49, %v1902_v42  ;;  %v944_v50 = vrot.slane %v943_v58, 1 }
 0x3ab   : > { %v880_v35 = vadd.f32 %v879_v6, %v878_v9  ;;  %v803_v0 = vpop.permute.xlu0 %802  ;;  %v1025_v48 = vsel %vm419_vm4, %v1910_v25, %v1024_v11  ;;  %v875_v60 = vadd.f32 %v874_v28, %v873_v30  ;;  %v967_v51 = vrot.slane %v966_v23, 4 }
 0x3ac   : > { %v828_v33 = vmul.f32 %v803_v0, %v1592_v38  ;;  %v973_v10 = vsel %vm233_vm0, %v915_v31, 0.0  ;;  %v952_v9 = vadd.f32 %v951_v3, %v950_v59  ;;  %v936_v28 = vadd.f32 %v935_v54, %v934_v47 }
 0x3ad   : > { %v881_v13 = vrot.slane %v880_v35, 2  ;;  %v995_v40 = vmul.f32 0.0625, %v875_v60  ;;  %v968_v4 = vadd.f32 %v967_v51, %v966_v23  ;;  %v1001_v51 = vmul.f32 %v1890_v55, %v1890_v55 }
 0x3ae   : > { %v886_v26 = vsel %vm233_vm0, %v828_v33, 0.0  ;;  %v916_v36 = vmul.f32 %v828_v33, %v1592_v38  ;;  %v1928_v38 = vmul.f32 %v1869_v29, %v1869_v29  ;;  %v1000_v29 = vmul.f32 %v1871_v46, %v1871_v46 }
 0x3af   : > { %v882_v14 = vadd.f32 %v881_v13, %v880_v35  ;;  %v887_v20 = vadd.f32 %v886_v26, %v885_v53  ;;  %v813_v19 = vpop.permute.xlu0 %812  ;;  %v1026_v37 = vsel %vm421_vm5, %v995_v40, %v1025_v48  ;;  %v969_v62 = vrot.slane %v968_v4, 2 }
 0x3b0   : > { %v974_v18 = vsel %vm233_vm0, %v916_v36, 0.0  ;;  %v830_v43 = vmul.f32 %v813_v19, %v1602_v44  ;;  %v1007_v0 = vsub.f32 %v927_v15, %v1928_v38  ;;  %v953_v46 = vrot.slane %v952_v9, 1 }
 0x3b1   : > { %v883_v11 = vrot.slane %v882_v14, 1  ;;  %v888_v24 = vrot.slane %v887_v20, 4  ;;  %v975_v2 = vadd.f32 %v974_v18, %v973_v10  ;;  %v970_v6 = vadd.f32 %v969_v62, %v968_v4 }
 0x3b2   : > { %v895_v61 = vsel %vm233_vm0, %v830_v43, 0.0  ;;  %v918_v1 = vmul.f32 %v830_v43, %v1602_v44  ;;  %v961_v44 = vadd.f32 %v960_v17, %v959_v12  ;;  %v1002_v42 = vmul.f32 %v1910_v25, %v1910_v25 }
 0x3b3   : > { %v884_v39 = vadd.f32 %v883_v11, %v882_v14  ;;  %v889_v41 = vadd.f32 %v888_v24, %v887_v20  ;;  %v976_v8 = vrot.slane %v975_v2, 4  ;;  %v896_v27 = vadd.f32 %v895_v61, %v894_v45 }
 0x3b4   : > { %v983_v52 = vsel %vm233_vm0, %v918_v1, 0.0  ;;  %v962_v33 = vrot.slane %v961_v44, 1  ;;  %v971_v49 = vrot.slane %v970_v6, 1  ;;  %v945_v13 = vadd.f32 %v944_v50, %v943_v58 }
 0x3b5   : > { %v996_v22 = vmul.f32 0.0625, %v884_v39  ;;  %v890_v63 = vrot.slane %v889_v41, 2  ;;  %v977_v7 = vadd.f32 %v976_v8, %v975_v2  ;;  %v897_v34 = vrot.slane %v896_v27, 4 }
 0x3b6   : > { %v984_v30 = vadd.f32 %v983_v52, %v982_v32  ;;  %v1008_v32 = vsub.f32 %v936_v28, %v1000_v29  ;;  %v1003_v53 = vmul.f32 %v995_v40, %v995_v40  ;;  %v954_v12 = vadd.f32 %v953_v46, %v952_v9 }
 0x3b7   : > { %v891_v5 = vadd.f32 %v890_v63, %v889_v41  ;;  %v978_v16 = vrot.slane %v977_v7, 2  ;;  %v1027_v21 = vsel %vm423_vm6, %v996_v22, %v1026_v37  ;;  %v898_v23 = vadd.f32 %v897_v34, %v896_v27 }
 0x3b8   : > { %v985_v45 = vrot.slane %v984_v30, 4  ;;  %v1004_v14 = vmul.f32 %v996_v22, %v996_v22  ;;  %v1009_v19 = vsub.f32 %v945_v13, %v1001_v51  ;;  %v963_v4 = vadd.f32 %v962_v33, %v961_v44 }
 0x3b9   : > { %v892_v35 = vrot.slane %v891_v5, 1  ;;  %v979_v31 = vadd.f32 %v978_v16, %v977_v7  ;;  %v899_v48 = vrot.slane %v898_v23, 2  ;;  %v1010_v43 = vsub.f32 %v954_v12, %v1002_v42 }
 0x3ba   : > { %v986_v60 = vadd.f32 %v985_v45, %v984_v30  ;;  %v972_v37 = vadd.f32 %v971_v49, %v970_v6  ;;  %v1011_v24 = vsub.f32 %v963_v4, %v1003_v53  ;;  %v1039_v38 = vsel %vm415_vm2, %v1008_v32, %v1007_v0 }
 0x3bb   : > { %v893_v56 = vadd.f32 %v892_v35, %v891_v5  ;;  %v900_v59 = vadd.f32 %v899_v48, %v898_v23  ;;  %v980_v26 = vrot.slane %v979_v31, 1  ;;  %v1040_v61 = vsel %vm417_vm3, %v1009_v19, %v1039_v38 }
 0x3bc   : > { %v987_v47 = vrot.slane %v986_v60, 2  ;;  %v1012_v40 = vsub.f32 %v972_v37, %v1004_v14  ;;  %v1041_v39 = vsel %vm419_vm4, %v1010_v43, %v1040_v61 }
 0x3bd   : > { %v997_v36 = vmul.f32 0.0625, %v893_v56  ;;  %v901_v10 = vrot.slane %v900_v59, 1  ;;  %v981_v11 = vadd.f32 %v980_v26, %v979_v31  ;;  %v1042_v8 = vsel %vm421_vm5, %v1011_v24, %v1041_v39 }
 0x3be   : > { %v988_v20 = vadd.f32 %v987_v47, %v986_v60  ;;  %v1043_v62 = vsel %vm423_vm6, %v1012_v40, %v1042_v8 }
 0x3bf   : > { %v1005_v18 = vmul.f32 %v997_v36, %v997_v36  ;;  %v1028_v55 = vsel %vm425_vm7, %v997_v36, %v1027_v21  ;;  %v902_v57 = vadd.f32 %v901_v10, %v900_v59 }
 0x3c0   : > { %v989_v25 = vrot.slane %v988_v20, 1 }
 0x3c1   : > { %v998_v2 = vmul.f32 0.0625, %v902_v57  ;;  %v1013_v3 = vsub.f32 %v981_v11, %v1005_v18 }
 0x3c2   : > { %v990_v1 = vadd.f32 %v989_v25, %v988_v20 }
 0x3c3   : > { %v1006_v17 = vmul.f32 %v998_v2, %v998_v2  ;;  %v1029_v41 = vsel %vm427_vm8, %v998_v2, %v1028_v55  ;;  %v1044_v27 = vsel %vm425_vm7, %v1013_v3, %v1043_v62 }
 0x3c5   : > { %v1014_v54 = vsub.f32 %v990_v1, %v1006_v17 }
 0x3c7   : > { %v1045_v52 = vsel %vm427_vm8, %v1014_v54, %v1044_v27 }
 0x3c8   : > { %1046 = vrot.lane.b32.xlu1 %v1045_v52, %s1388_s24 }
 0x43a   : > { %v1047_v58 = vpop.permute.xlu1 %1046 }
 0x43b   : > { %v1049_v22 = vsel %vm233_vm0, %v1029_v41, %v1047_v58 }
 0x43c   : > { %1051 = vst.msk [vmem:[%s191_s12] sm:$0xff] %vm1050_vm10, %v1049_v22 }
 0x43d   : > { %1329 = shalt.err (!%p1326_p2)
}
 0x43e   : > { %s1330_s30 = scalar_lea.hbm %s1956_s21, 128  ;;  %s1334_s10 = scalar_lea.hbm %s2004_s3, 256 }
 0x43f   : > { %p1331_p4 = scmp.ne.s32.totalorder %s1956_s21, %s1330_s30  ;;  %p1335_p9 = scmp.lt.u32.totalorder %s1956_s21, %s2004_s3 }
 0x440   : > { %p1336_p1 = scmp.lt.u32.totalorder %s1334_s10, %s1330_s30  ;;  %p1338_p6 = scmp.lt.u32.totalorder %s1330_s30, %s1956_s21 }
 0x441   : > { %p1332_p5 = pnand %p1331_p4, %p2017_p11 }
 0x442   : > { %p1337_p3 = por %p1336_p1, %p1335_p9 }
 0x443   : > { %p1333_p7 = pneg %p1332_p5 }
 0x444   : > { %p1339_p12 = por %p1338_p6, %p1337_p3 }
 0x446   : > { %p1340_p13 = pnand %p1339_p12, %p1333_p7 }
 0x448   : > { %1343 = shalt.err (!%p1340_p13)
}
 0x449   : > { %1156 = dma.vmem_to_hbm [thread:$0]  (%p2017_p11), %s1958_s13, 128, %s1956_s21, %s1053_s23  }
 0x44a PF: > { %s1078_s7 = sand.u32 1, %s1370_s14   ;;  %p2018_p8 = scmp.ne.s32.totalorder %s2012_s26, 0 }
 0x44b   : > { %p2019_p10 = scmp.ge.s32.totalorder %s1382_s17, 2  ;;  %s1079_s24 = scalar_lea.sflag [#allocation5], %s1078_s7 }
 0x44d   : > { %p1163_p0 = pnand %p2019_p10, %p2018_p8 }
 0x44f   : > { %1365 = dma.done.wait (!%p1163_p0), %s1079_s24, 128  }
 0x450   : > { %1367 = vsyncadd (!%p1163_p0), %s1079_s24, 4294967168  ;;  %p18_p2 = scmp.ge.s32.totalorder %s1438_s19, 4   ;;  %s2020_s14 = smov %s1374_s15 }
 0x451   : > { %s2021_s15 = smov %s1378_s16  ;;  %s2022_s16 = smov %s1450_s22 }
 0x452   : > { %s2023_s17 = smov %s1438_s19  ;;  %20 = sbr.rel (!%p18_p2) target bundleno = 8 (0x8), region = 77 }
 0x459   :  { %1084 = vsyncpa [#allocation4], 1 }
 0x45a   :  { %1086 = vsyncpa [#allocation4 + $0x1], 1 }
 0x45b   :  { %1087 = vsyncpa [#allocation5], 1 }
 0x45c   :  { %1089 = vsyncpa [#allocation5 + $0x1], 1 }

</bundles_post_ra>
